<compile_context>
chip_gen: v7x
topology: tpu7x:2x2x1
jax: 0.10.0
libtpu: 0.0.40
codegen_flags: <defaults>
</compile_context>

<pallas_src>
import functools

import jax
import jax.numpy as jnp
from jax.experimental import pallas as pl
from jax.experimental.pallas import tpu as pltpu

# Lane-axis chunk (elements) used both for the pooled reduction and the
# streamed scale: keeps the statically unrolled loops short while bounding
# vreg pressure (C=4 rows x 8192 lanes x 4B = 128 KiB per chunk at f32).
_CHUNK = 8 * 1024


def _eca_kernel(w_ref, x_ref, o_ref, *, k_size: int):
    # w_ref: SMEM (k_size,) float32 conv taps.
    # x_ref / o_ref: VMEM (1, C, H*W) block for one batch element.
    _, c, hw = x_ref.shape

    # 1) Global average pool over the flattened spatial (lane) axis, f32 acc.
    #    Chunked reads so the reduction never keeps the whole block live.
    acc = jnp.zeros((1, c), dtype=jnp.float32)
    for start in range(0, hw, _CHUNK):
        size = min(_CHUNK, hw - start)
        xc = x_ref[:, :, start:start + size].astype(jnp.float32)
        acc = acc + jnp.sum(xc, axis=-1)
    y = acc * jnp.float32(1.0 / hw)                          # (1, C)

    # 2) Conv1d(1, 1, k, padding=(k-1)//2, bias=False) over the channel axis
    #    (cross-correlation, zero padded), taps statically unrolled.
    #    (ECA uses odd k_size; even k_size would change the output length in
    #    the original PyTorch module as well.)
    pad = (k_size - 1) // 2
    if pad > 0:
        zeros = jnp.zeros((1, pad), dtype=jnp.float32)
        y_pad = jnp.concatenate([zeros, y, zeros], axis=1)   # (1, C + 2*pad)
    else:  # k_size == 1: no padding needed
        y_pad = y
    conv = jnp.zeros((1, c), dtype=jnp.float32)
    for k in range(k_size):
        conv = conv + w_ref[k] * y_pad[:, k:k + c]

    # 3) Sigmoid gate in f32 (EUP), cast once to the output dtype.
    gate = jax.nn.sigmoid(conv).astype(o_ref.dtype)[:, :, None]   # (1, C, 1)

    # 4) Re-read x and scale in native dtype; streamed load-mul-store so the
    #    live set stays at one chunk of vregs.
    for start in range(0, hw, _CHUNK):
        size = min(_CHUNK, hw - start)
        o_ref[:, :, start:start + size] = (
            x_ref[:, :, start:start + size] * gate
        )


def eca_forward(x: jax.Array, weight: jax.Array) -> jax.Array:
    """x: (B, C, H, W); weight: (k_size,) float32 (Conv1d(1,1,k) weight squeezed)."""
    B, C, H, W = x.shape
    HW = H * W
    k_size = int(weight.shape[0])
    itemsize = jnp.dtype(x.dtype).itemsize

    # Lane-dense layout: flatten spatial dims (free reshape for contiguous NCHW).
    x_flat = x.reshape(B, C, HW)

    # Double-buffered input + output blocks per grid step, plus slack.
    # Cap at 64 MiB so the same limit is safe on v5e/v6e (128 MiB physical)
    # and v7x (64 MiB physical).  For activations where 4*block > 64 MiB,
    # split into a GAP pass + scale pass instead of raising this further.
    block_bytes = C * HW * itemsize
    vmem_limit = int(min(max(4 * block_bytes + (2 << 20), 32 << 20), 64 << 20))

    cost = pl.CostEstimate(
        flops=3 * B * C * HW + 2 * B * C * k_size,
        transcendentals=B * C,
        bytes_accessed=2 * B * C * HW * itemsize,
    )

    kernel = functools.partial(_eca_kernel, k_size=k_size)
    out_flat = pl.pallas_call(
        kernel,
        out_shape=jax.ShapeDtypeStruct((B, C, HW), x.dtype),
        grid=(B,),
        in_specs=[
            pl.BlockSpec(memory_space=pltpu.SMEM),           # conv taps
            pl.BlockSpec((1, C, HW), lambda b: (b, 0, 0)),   # x, one batch / step
        ],
        out_specs=pl.BlockSpec((1, C, HW), lambda b: (b, 0, 0)),
        compiler_params=pltpu.CompilerParams(
            dimension_semantics=("parallel",),
            vmem_limit_bytes=vmem_limit,
        ),
        cost_estimate=cost,
    )(weight.astype(jnp.float32), x_flat)
    return out_flat.reshape(B, C, H, W)


def eca_reference(x, weight):
    """Pure-JAX reference matching the PyTorch forward semantics."""
    k_size = weight.shape[0]
    pad = (k_size - 1) // 2
    y = jnp.mean(x.astype(jnp.float32), axis=(2, 3))          # (B, C)
    y_pad = jnp.pad(y, ((0, 0), (pad, pad)))
    out = jnp.zeros_like(y)
    for k in range(k_size):
        out = out + weight[k] * y_pad[:, k:k + y.shape[1]]
    s = jax.nn.sigmoid(out)[:, :, None, None]
    return (x.astype(jnp.float32) * s).astype(x.dtype)


if __name__ == "__main__":
    key = jax.random.PRNGKey(0)
    kx, kw = jax.random.split(key)

    B, C, H, W = 2, 4, 16, 16
    k_size = 3

    x = jax.random.normal(kx, (B, C, H, W), dtype=jnp.float32)
    # Deterministic Conv1d(1, 1, k_size, bias=False) weight init
    # (uniform in [-1/sqrt(k_size), 1/sqrt(k_size)], like PyTorch's default).
    bound = 1.0 / (k_size ** 0.5)
    weight = jax.random.uniform(kw, (k_size,), dtype=jnp.float32,
                                minval=-bound, maxval=bound)

    out = eca_forward(x, weight)
    out = jax.block_until_ready(out)

    ref = eca_reference(x, weight)
    assert out.shape == x.shape and out.dtype == x.dtype
    assert jnp.allclose(out, ref, atol=1e-5, rtol=1e-5)

    print("KERNEL_OK")
</pallas_src>

<mosaic_0001>
module attributes {stable_mosaic.version = 11 : i64} {
  func.func @_eca_kernel(%arg0: i32, %arg1: memref<3xf32, #tpu.memory_space<smem>>, %arg2: memref<1x4x256xf32, #tpu.memory_space<vmem>>, %arg3: memref<1x4x256xf32, #tpu.memory_space<vmem>>) attributes {dimension_semantics = [#tpu.dimension_semantics<parallel>], iteration_bounds = array<i64: 2>, scalar_prefetch = 0 : i64, scratch_operands = 0 : i64, tpu.core_type = #tpu.core_type<tc>, window_params = [{transform_indices = @transform_0, window_bounds = array<i64: 3>}, {transform_indices = @transform_1, window_bounds = array<i64: 1, 4, 256>}, {transform_indices = @transform_2, window_bounds = array<i64: 1, 4, 256>}]} {
    %cst = arith.constant 0.000000e+00 : f32
    %0 = vector.broadcast %cst : f32 to vector<1x4xf32>
    %c0 = arith.constant 0 : index
    %c0_0 = arith.constant 0 : index
    %c0_1 = arith.constant 0 : index
    %1 = vector.load %arg2[%c0, %c0_0, %c0_1] : memref<1x4x256xf32, #tpu.memory_space<vmem>>, vector<1x4x256xf32>
    %cst_2 = arith.constant dense<0.000000e+00> : vector<1x4xf32>
    %2 = vector.multi_reduction <add>, %1, %cst_2 [2] : vector<1x4x256xf32> to vector<1x4xf32>
    %3 = arith.addf %0, %2 : vector<1x4xf32>
    %cst_3 = arith.constant 3.906250e-03 : f32
    %4 = vector.broadcast %cst_3 : f32 to vector<1x4xf32>
    %5 = arith.mulf %3, %4 : vector<1x4xf32>
    %cst_4 = arith.constant 0.000000e+00 : f32
    %6 = vector.broadcast %cst_4 : f32 to vector<1x1xf32>
    %7 = tpu.concatenate %6, %5, %6 in 1 : vector<1x1xf32>, vector<1x4xf32>, vector<1x1xf32> -> vector<1x6xf32>
    %cst_5 = arith.constant 0.000000e+00 : f32
    %8 = vector.broadcast %cst_5 : f32 to vector<1x4xf32>
    %c0_6 = arith.constant 0 : index
    %9 = memref.load %arg1[%c0_6] : memref<3xf32, #tpu.memory_space<smem>>
    %10 = vector.extract_strided_slice %7 {offsets = [0, 0], sizes = [1, 4], strides = [1, 1]} : vector<1x6xf32> to vector<1x4xf32>
    %11 = vector.broadcast %9 : f32 to vector<1x4xf32>
    %12 = arith.mulf %11, %10 : vector<1x4xf32>
    %13 = arith.addf %8, %12 : vector<1x4xf32>
    %c1 = arith.constant 1 : index
    %14 = memref.load %arg1[%c1] : memref<3xf32, #tpu.memory_space<smem>>
    %15 = vector.extract_strided_slice %7 {offsets = [0, 1], sizes = [1, 4], strides = [1, 1]} : vector<1x6xf32> to vector<1x4xf32>
    %16 = vector.broadcast %14 : f32 to vector<1x4xf32>
    %17 = arith.mulf %16, %15 : vector<1x4xf32>
    %18 = arith.addf %13, %17 : vector<1x4xf32>
    %c2 = arith.constant 2 : index
    %19 = memref.load %arg1[%c2] : memref<3xf32, #tpu.memory_space<smem>>
    %20 = vector.extract_strided_slice %7 {offsets = [0, 2], sizes = [1, 4], strides = [1, 1]} : vector<1x6xf32> to vector<1x4xf32>
    %21 = vector.broadcast %19 : f32 to vector<1x4xf32>
    %22 = arith.mulf %21, %20 : vector<1x4xf32>
    %23 = arith.addf %18, %22 : vector<1x4xf32>
    %24 = arith.negf %23 : vector<1x4xf32>
    %25 = math.exp %24 : vector<1x4xf32>
    %cst_7 = arith.constant 1.000000e+00 : f32
    %26 = vector.broadcast %cst_7 : f32 to vector<1x4xf32>
    %27 = arith.addf %26, %25 : vector<1x4xf32>
    %28 = arith.divf %26, %27 : vector<1x4xf32>
    %29 = vector.shape_cast %28 : vector<1x4xf32> to vector<1x4x1xf32>
    %c0_8 = arith.constant 0 : index
    %c0_9 = arith.constant 0 : index
    %c0_10 = arith.constant 0 : index
    %30 = vector.load %arg2[%c0_8, %c0_9, %c0_10] : memref<1x4x256xf32, #tpu.memory_space<vmem>>, vector<1x4x256xf32>
    %31 = vector.broadcast %29 : vector<1x4x1xf32> to vector<1x4x256xf32>
    %32 = arith.mulf %30, %31 : vector<1x4x256xf32>
    %c0_11 = arith.constant 0 : index
    %c0_12 = arith.constant 0 : index
    %c0_13 = arith.constant 0 : index
    %33 = vector.load %arg3[%c0_11, %c0_12, %c0_13] : memref<1x4x256xf32, #tpu.memory_space<vmem>>, vector<1x4x256xf32>
    tpu.vector_store %arg3[%c0_11, %c0_12, %c0_13], %32 {strides = array<i32>} : memref<1x4x256xf32, #tpu.memory_space<vmem>>, vector<1x4x256xf32>,
    return
  }
  func.func @transform_0(%arg0: i32) -> i32 {
    %c0_i32 = arith.constant 0 : i32
    %c0_i32_0 = arith.constant 0 : i32
    return %c0_i32 : i32
  }
  func.func @transform_1(%arg0: i32) -> (i32, i32, i32) {
    %c0_i32 = arith.constant 0 : i32
    %c0_i32_0 = arith.constant 0 : i32
    %c0_i32_1 = arith.constant 0 : i32
    return %arg0, %c0_i32, %c0_i32_0 : i32, i32, i32
  }
  func.func @transform_2(%arg0: i32) -> (i32, i32, i32) {
    %c0_i32 = arith.constant 0 : i32
    %c0_i32_0 = arith.constant 0 : i32
    %c0_i32_1 = arith.constant 0 : i32
    return %arg0, %c0_i32, %c0_i32_0 : i32, i32, i32
  }
}

</mosaic_0001>

<bundles_post_ra>
// kernel: tpu_custom_call.1
= control target key start
LH: loop header
LB: loop body
LE: loop exit
PB: predicated region body
PF: predicated region fallthrough
CT: control target
= control target key end

     0   :  { %7 = vsyncpa [#allocation5], 0  ;;  %s769_s0 = inlined_call_operand.hbm [shape: f32[3], index: 0, kind: input, shape index: {}]   ;;  %s770_s1 = inlined_call_operand.hbm [shape: f32[2,4,256], index: 1, kind: input, shape index: {}]   ;;  %s771_s2 = inlined_call_operand.hbm [shape: f32[2,4,256], index: 2, kind: output, shape index: {}]  }
   0x1   :  { %8 = vsyncpa [#allocation3], 0 }
   0x2   :  { %10 = vsyncpa [#allocation3 + $0x1], 0 }
   0x3   :  { %11 = vsyncpa [#allocation4], 0 }
   0x4   :  { %13 = vsyncpa [#allocation4 + $0x1], 0  ;;  %s560_s9 = smov 0   ;;  %s562_s10 = smov 0  }
   0x5   :  { %s564_s11 = smov 0   ;;  %s566_s12 = smov 0  }
   0x6 LB: > { %s581_s13 = sadd.s32 4294967295, %s537_s12   ;;  %s338_s14 = sadd.s32 4294967294, %s537_s12   ;;  %s537_s12 = sphi %s566_s12, %s792_s12   ;;  %s533_s11 = sphi %s564_s11, %s791_s11   ;;  %s529_s10 = sphi %s562_s10, %s790_s10   ;;  %s525_s9 = sphi %s560_s9, %s789_s9  }
   0x7   : > { %p60_p0 = scmp.ne.s32.totalorder %s529_s10, %s525_s9  ;;  %p772_p1 = scmp.eq.s32.totalorder %s581_s13, 0 }
   0x8   : > { %p90_p3 = scmp.eq.s32.totalorder %s338_s14, 1  ;;  %p339_p5 = scmp.ge.s32.totalorder %s537_s12, 1 }
   0x9   : > { %p590_p4 = por %p772_p1, %p60_p0  ;;  %p97_p7 = scmp.lt.s32.totalorder %s537_s12, 3 }
   0xa   : > { %p595_p6 = por %p90_p3, %p60_p0  ;;  %s606_s18 = sadd.s32 1, %s537_s12  }
   0xb   : > { %s775_s15 = scalar_select %p590_p4, 1, 0 }
   0xc   : > { %s776_s16 = scalar_select %p595_p6, 1, 0 }
   0xd   : > { %p600_p8 = pnand %p339_p5, %p97_p7  ;;  %s44_s19 = ssub.s32 %s537_s12, %s606_s18 }
   0xe   : > { %s47_s20 = sadd.s32 1, %s533_s11  ;;  %p619_p12 = scmp.eq.s32.totalorder %s44_s19, 0 }
   0xf   : > { %p367_p10 = pneg %p600_p8  ;;  %p54_p13 = scmp.ne.s32.totalorder %s533_s11, %s529_s10 }
  0x10   : > { %p55_p0 = scmp.eq.s32.totalorder %s537_s12, 0  ;;  %p380_p3 = scmp.lt.s32.totalorder %s537_s12, 2 }
  0x11   : > { %p615_p11 = pnand %p367_p10, %p772_p1  ;;  %s424_s25 = scalar_lea.hbm %s769_s0, 16 }
  0x12   : > { %p425_p5 = scmp.ne.s32.totalorder %s769_s0, %s424_s25  ;;  %p431_p1 = scmp.lt.u32.totalorder %s424_s25, %s769_s0 }
  0x13   : > { %p426_p7 = pneg %p615_p11 }
  0x15   : > { %p427_p10 = pnand %p426_p7, %p425_p5 }
  0x17   : > { %p428_p9 = pneg %p427_p10 }
  0x19   : > { %p433_p2 = pnand %p431_p1, %p428_p9 }
  0x1b   : > { %436 = shalt.err (!%p433_p2)
}
  0x1c   : > { %s539_s30 = smov [#allocation2]   ;;  %p56_p1 = por %p55_p0, %p54_p13 }
  0x1d   : > { %370 = dma.hbm_to_smem (!%p615_p11), %s769_s0, 16, %s539_s30, [#allocation5]  }
  0x1e   : > { %s646_s5 = scalar_select %p619_p12, %s533_s11, %s47_s20  }
  0x1f   : > { %p780_p2 = scmp.eq.s32.totalorder %s581_s13, 1  ;;  %s119_s7 = sand.u32 1, %s533_s11  }
  0x20   : > { %s357_s8 = sshll.u32 %s537_s12, 7  ;;  %s342_s14 = sshll.u32 %s119_s7, 3 }
  0x21   : > { %p658_p9 = por %p780_p2, %p54_p13  ;;  %s667_s23 = scalar_lea.hbm %s770_s1, %s357_s8 }
  0x22   : > { %s123_s20 = scalar_lea.vmem [#allocation6], %s342_s14  ;;  %p671_p11 = pnand %p380_p3, %p56_p1 }
  0x23   : > { %s781_s6 = scalar_select %p658_p9, 1, 0 }
  0x24   : > { %s131_s22 = sshll.u32 %s123_s20, 4  ;;  %s120_s25 = scalar_lea.sflag [#allocation3], %s119_s7  ;;  %s675_s22 = int_to_ptr.vmem [resolvable:$true] %s131_s22 }
  0x25   : > { %s437_s26 = scalar_lea.hbm %s667_s23, 128  ;;  %p439_p13 = pneg %p671_p11 }
  0x26   : > { %p438_p12 = scmp.ne.s32.totalorder %s667_s23, %s437_s26  ;;  %s442_s29 = scalar_lea.hbm %s770_s1, 256 }
  0x27   : > { %p443_p3 = scmp.lt.u32.totalorder %s667_s23, %s770_s1  ;;  %p444_p7 = scmp.lt.u32.totalorder %s442_s29, %s437_s26 }
  0x28   : > { %p440_p0 = pnand %p439_p13, %p438_p12  ;;  %p446_p1 = scmp.lt.u32.totalorder %s437_s26, %s667_s23 }
  0x29   : > { %p445_p10 = por %p444_p7, %p443_p3 }
  0x2a   : > { %p441_p5 = pneg %p440_p0 }
  0x2b   : > { %p447_p2 = por %p446_p1, %p445_p10 }
  0x2d   : > { %p448_p6 = pnand %p447_p2, %p441_p5 }
  0x2f   : > { %451 = shalt.err (!%p448_p6)
}
  0x30   : > { %s452_s4 = scalar_lea.vmem %s675_s22, 128  ;;  %s540_s7 = smov [#allocation6]  }
  0x31   : > { %p453_p12 = scmp.ne.s32.totalorder %s675_s22, %s452_s4  ;;  %s457_s8 = sshll.u32 %s540_s7, 4  ;;  %s458_s8 = int_to_ptr.vmem [resolvable:$false] %s457_s8 }
  0x32   : > { %s459_s14 = scalar_lea.vmem %s458_s8, 256  ;;  %p460_p4 = scmp.lt.s32.totalorder %s675_s22, %s458_s8 }
  0x33   : > { %p455_p0 = pnand %p453_p12, %p439_p13  ;;  %p461_p3 = scmp.lt.s32.totalorder %s459_s14, %s452_s4 }
  0x35   : > { %p456_p9 = pneg %p455_p0  ;;  %p462_p7 = por %p461_p3, %p460_p4 }
  0x37   : > { %p463_p10 = pnand %p462_p7, %p456_p9 }
  0x39   : > { %466 = shalt.err (!%p463_p10)
}
  0x3a   : > { %374 = dma.hbm_to_vmem [thread:$0]  (!%p671_p11), %s667_s23, 128, %s675_s22, %s120_s25  }
  0x3b   : > { %140 = sbr.rel (%p600_p8) target bundleno = 509 (0x1fd), region = 28  ;;  %p783_p6 = scmp.eq.s32.totalorder (!%p600_p8), %s581_s13, 0 }
  0x42   : > { %512 = dma.done.wait (%p783_p6), [#allocation5], 16   ;;  %p784_p13 = pmov %p783_p6 }
  0x43   : > { %s709_s19 = sand.u32 1, %s529_s10   ;;  %p785_p4 = scmp.ne.s32.totalorder %s775_s15, 0 }
  0x44   : > { %514 = vsyncadd (%p784_p13), [#allocation5], 4294967280  ;;  %s347_s21 = sshll.u32 %s709_s19, 3  ;;  %s147_s20 = scalar_lea.sflag [#allocation3], %s709_s19 }
  0x45   : > { %s150_s23 = scalar_lea.vmem [#allocation6], %s347_s21 }
  0x46   : > { %516 = dma.done.wait (%p785_p4), %s147_s20, 128  }
  0x47   : > { %518 = vsyncadd (%p785_p4), %s147_s20, 4294967168 }
  0x48   : > { %155 = sfence }
  0x49   : > { %v172_v0 = vld [vmem:[%s150_s23] sm:$0xff]  ;;  %vm176_vm0 = vcmask 1043456   ;;  %v185_v5 = vlaneseq  ;;  %s350_s17 = sld [smem:[#allocation2 + $0x2]]  ;;  %s349_s22 = sld [smem:[#allocation2 + $0x1]]  ;;  %vm193_vm1 = vcmask 7168   ;;  %vm195_vm2 = vcmask 39936  }
  0x4a   : > { %v174_v1 = vcombine.high %v172_v0, %v172_v0  ;;  %v177_v2 = vsel %vm176_vm0, %v172_v0, 0.0  ;;  %s541_s15 = smov 126   ;;  %s542_s24 = smov 127   ;;  %v543_v31 = vmov 839922192  }
  0x4b   : > { %v186_v6 = vand.u32 127, %v185_v5  ;;  %v189_v8 = vshrl.u32 %v185_v5, 7  ;;  %s197_s25 = sld [smem:[#allocation2]]  ;;  %v232_v32 = vunpack.c.l.s4 %v543_v31  ;;  %s358_s26 = sshll.u32 %s581_s13, 7 }
  0x4c   : > { %v178_v3 = vsel %vm176_vm0, %v174_v1, 0.0  ;;  %s171_s27 = scalar_lea.vmem [#allocation7], %s347_s21  ;;  %s725_s3 = scalar_lea.hbm %s771_s2, %s358_s26 }
  0x4d   : > { %v179_v4 = vadd.f32 %v178_v3, %v177_v2  ;;  %v187_v7 = vadd.s32 4294967295, %v186_v6  ;;  %v225_v28 = vsub.s32 0, %v189_v8  ;;  %v233_v33 = vunpack.c.0.s8 %v232_v32  ;;  %s256_s28 = sshll.u32 %s171_s27, 4  ;;  %s242_s4 = scalar_lea.sflag [#allocation4], %s709_s19  ;;  %s727_s28 = int_to_ptr.vmem [resolvable:$true] %s256_s28 }
  0x4e   : > { %s467_s7 = scalar_lea.vmem %s727_s28, 128  ;;  %p786_p9 = scmp.ne.s32.totalorder %s781_s6, 0 }
  0x4f   : > { %180 = vadd.xlane.f32.xlu0 %v179_v4  ;;  %v190_v9 = vsub.s32 %v187_v7, %v189_v8  ;;  %v210_v13 = vstv %s350_s17  ;;  %v202_v14 = vstv %s349_s22  ;;  %v236_v34 = vsub.s32 %v233_v33, %v189_v8  ;;  %p468_p8 = scmp.ne.s32.totalorder %s727_s28, %s467_s7  ;;  %s544_s13 = smov [#allocation7]  }
  0x50   : > { %s471_s8 = sshll.u32 %s544_s13, 4  ;;  %s472_s8 = int_to_ptr.vmem [resolvable:$false] %s471_s8 }
  0x51   : > { %v198_v19 = vstv %s197_s25  ;;  %p469_p11 = pnand %p468_p8, %p786_p9  ;;  %s473_s14 = scalar_lea.vmem %s472_s8, 256 }
  0x52   : > { %p474_p1 = scmp.lt.s32.totalorder %s727_s28, %s472_s8  ;;  %p475_p2 = scmp.lt.s32.totalorder %s473_s14, %s467_s7 }
  0x53   : > { %p470_p5 = pneg %p469_p11 }
  0x54   : > { %p476_p12 = por %p475_p2, %p474_p1 }
  0x56   : > { %p477_p0 = pnand %p476_p12, %p470_p5 }
  0xdc   : > { %v181_v10 = vpop.xlane.xlu0 %180 }
  0xdd   : > { %v183_v11 = vmul.f32 0.00390625, %v181_v10 }
  0xdf   : > { %v191_v12 = vrot.slane %v183_v11, %v190_v9 }
  0xe1   : > { %v194_v15 = vsel %vm193_vm1, 0.0, %v191_v12 }
  0xe2   : > { %v196_v16 = vsel %vm195_vm2, %v194_v15, 0.0 }
  0xe3   : > { %v211_v17 = vmul.f32 %v210_v13, %v196_v16  ;;  %v203_v18 = vmul.f32 %v202_v14, %v196_v16  ;;  %v199_v20 = vmul.f32 %v198_v19, %v196_v16 }
  0xe5   : > { %213 = vrot.lane.b32.xlu1 %v211_v17, %s541_s15  ;;  %205 = vrot.lane.b32.xlu0 %v203_v18, %s542_s24 }
 0x157   : > { %v206_v21 = vpop.permute.xlu0 %205  ;;  %v214_v23 = vpop.permute.xlu1 %213 }
 0x158   : > { %v208_v22 = vadd.f32 %v206_v21, %v199_v20 }
 0x15a   : > { %v216_v24 = vadd.f32 %v214_v23, %v208_v22 }
 0x15c   : > { %v351_v25 = vmul.f32 -1.442695, %v216_v24 }
 0x15e   : > { %420 = vpow2.f32 %v351_v25 }
 0x168   : > { %v421_v26 = vpop.eup %420 }
 0x169   : > { %v220_v27 = vadd.f32 1.0, %v421_v26 }
 0x16b   : > { %422 = vrcp.f32 %v220_v27 }
 0x175   : > { %v423_v29 = vpop.eup %422 }
 0x176   : > { %v226_v30 = vrot.slane %v423_v29, %v225_v28 }
 0x178   : > { %228 = vbcast.lane.b32.xlu1 %v226_v30, 256 }
 0x1ea   : > { %v229_v35 = vpop.permute.xlu1 %228 }
 0x1eb   : > { %v237_v36 = vrot.slane %v229_v35, %v236_v34 }
 0x1ed   : > { %v239_v37 = vmul.f32 %v237_v36, %v172_v0 }
 0x1ef   : > { %240 = vst [vmem:[%s171_s27] sm:$0xff] %v239_v37 }
 0x1f0   : > { %480 = shalt.err (!%p477_p0)
}
 0x1f1   : > { %s481_s19 = scalar_lea.hbm %s725_s3, 128  ;;  %s485_s23 = scalar_lea.hbm %s771_s2, 256 }
 0x1f2   : > { %p482_p3 = scmp.ne.s32.totalorder %s725_s3, %s481_s19  ;;  %p486_p6 = scmp.lt.u32.totalorder %s725_s3, %s771_s2 }
 0x1f3   : > { %p487_p13 = scmp.lt.u32.totalorder %s485_s23, %s481_s19  ;;  %p489_p8 = scmp.lt.u32.totalorder %s481_s19, %s725_s3 }
 0x1f4   : > { %p483_p7 = pnand %p482_p3, %p786_p9 }
 0x1f5   : > { %p488_p4 = por %p487_p13, %p486_p6 }
 0x1f6   : > { %p484_p10 = pneg %p483_p7 }
 0x1f7   : > { %p490_p11 = por %p489_p8, %p488_p4 }
 0x1f9   : > { %p491_p5 = pnand %p490_p11, %p484_p10 }
 0x1fb   : > { %494 = shalt.err (!%p491_p5)
}
 0x1fc   : > { %365 = dma.vmem_to_hbm [thread:$0]  (%p786_p9), %s727_s28, 128, %s725_s3, %s242_s4  }
 0x1fd PF: > { %s268_s15 = sand.u32 1, %s525_s9   ;;  %p787_p1 = scmp.ne.s32.totalorder %s776_s16, 0 }
 0x1fe   : > { %p788_p2 = scmp.ge.s32.totalorder %s537_s12, 2  ;;  %s269_s24 = scalar_lea.sflag [#allocation4], %s268_s15 }
 0x200   : > { %p376_p12 = pnand %p788_p2, %p787_p1 }
 0x202   : > { %520 = dma.done.wait (!%p376_p12), %s269_s24, 128  }
 0x203   : > { %522 = vsyncadd (!%p376_p12), %s269_s24, 4294967168  ;;  %p16_p0 = scmp.ge.s32.totalorder %s606_s18, 4   ;;  %s789_s9 = smov %s529_s10 }
 0x204   : > { %s790_s10 = smov %s533_s11  ;;  %s791_s11 = smov %s646_s5 }
 0x205   : > { %s792_s12 = smov %s606_s18  ;;  %18 = sbr.rel (!%p16_p0) target bundleno = 6 (0x6), region = 78 }
 0x20c   :  { %274 = vsyncpa [#allocation3], 1 }
 0x20d   :  { %276 = vsyncpa [#allocation3 + $0x1], 1 }
 0x20e   :  { %277 = vsyncpa [#allocation4], 1 }
 0x20f   :  { %279 = vsyncpa [#allocation4 + $0x1], 1 }
 0x210   :  { %280 = vsyncpa [#allocation5], 1 }
 0x211   :  { %282 = vsyncpa [#allocation5 + $0x1], 1 }

</bundles_post_ra>
